<compile_context>
chip_gen: v6e
topology: v6e:2x2x1
jax: 0.10.0
libtpu: 0.0.40
codegen_flags: <defaults>
</compile_context>

<pallas_src>
import functools

import jax
import jax.numpy as jnp
from jax.experimental import pallas as pl
from jax.experimental.pallas import tpu as pltpu


def _round_up(a, b):
    return ((a + b - 1) // b) * b


def _quantizer_kernel(mids_ref, cs_ref, perm_ref, x_ref, hard_ref, idx_ref, *, num_centers):
    """Sorted-boundary nearest-center search.

    mids_ref: SMEM (max(L-1,1),) f32  midpoints between adjacent sorted centers
    cs_ref:   SMEM (L,)          f32  centers sorted ascending
    perm_ref: SMEM (L,)          i32  original index of each sorted center
    x_ref:    VMEM (bm, 128)     f32
    """
    x = x_ref[...]

    hard = jnp.full(x.shape, cs_ref[0], dtype=jnp.float32)
    idx = jnp.full(x.shape, perm_ref[0], dtype=jnp.int32)

    # Unrolled at trace time; num_centers is a small Python int (e.g. 6).
    for l in range(num_centers - 1):
        # Strict '>' keeps a tie at a midpoint on the lower center, matching the
        # first-index semantics of argmin / torch.min for sorted centers.
        ge = x > mids_ref[l]
        hard = jnp.where(ge, cs_ref[l + 1], hard)
        idx = jnp.where(ge, perm_ref[l + 1], idx)

    hard_ref[...] = hard
    idx_ref[...] = idx.astype(idx_ref.dtype)


def quantizer_forward(x, centers, sigma):
    """x: (N, C, H, W) float32, centers: (L,) float32.

    Returns (x_soft, x_hard, idx) with torch-forward semantics: x_soft values ==
    x_hard.  idx is int8 (int32 if L > 127) rather than torch's int64.
    """
    assert x.dtype == jnp.float32 and centers.dtype == jnp.float32
    assert x.ndim == 4 and centers.ndim == 1
    del sigma  # forward values do not depend on sigma (soft path is dead forward-only)

    N, C, H, W = x.shape
    L = centers.shape[0]
    total = N * C * H * W
    idx_dtype = jnp.int8 if L <= 127 else jnp.int32

    # Tiny (length-L) tables for the sorted-boundary search.
    perm = jnp.argsort(centers).astype(jnp.int32)   # sorted position -> original index
    cs = centers[perm]                              # centers sorted ascending
    if L > 1:
        mids = ((cs[:-1] + cs[1:]) * 0.5).astype(jnp.float32)
    else:
        mids = jnp.zeros((1,), jnp.float32)         # dummy; the loop body never reads it

    lane_w = 128
    main = (total // lane_w) * lane_w               # aligned prefix handled by the kernel
    xf = x.reshape(-1)                              # free reshape (no copy)

    hard_flat = idx_flat = None
    if main:
        M = main // lane_w
        x2 = xf[:main].reshape(M, lane_w)

        if M <= 32:
            block_rows = M                          # single full-extent block (tiling rule waived)
        else:
            target_rows = max(32, (2 << 20) // (4 * lane_w))   # ~2 MiB f32 per block
            # >= 4 grid steps keeps both v7x TensorCores fed with >= 2 double-buffered
            # steps each; multiples of 32 satisfy the int8 output (32, 128) tile rule.
            split_rows = _round_up(pl.cdiv(M, 4), 32)
            block_rows = max(32, min(target_rows, split_rows))
        grid = (pl.cdiv(M, block_rows),)            # ragged last block handled by Pallas

        kernel = functools.partial(_quantizer_kernel, num_centers=L)
        blk = lambda i, mids_s, cs_s, perm_s: (i, 0)

        hard_m, idx_m = pl.pallas_call(
            kernel,
            out_shape=(
                jax.ShapeDtypeStruct((M, lane_w), jnp.float32),  # x_hard
                jax.ShapeDtypeStruct((M, lane_w), idx_dtype),    # nearest-center index
            ),
            grid_spec=pltpu.PrefetchScalarGridSpec(
                num_scalar_prefetch=3,
                grid=grid,
                in_specs=[pl.BlockSpec((block_rows, lane_w), blk)],
                out_specs=[
                    pl.BlockSpec((block_rows, lane_w), blk),
                    pl.BlockSpec((block_rows, lane_w), blk),
                ],
            ),
            compiler_params=pltpu.CompilerParams(
                dimension_semantics=("parallel",),      # megacore sharding on v7x
                vmem_limit_bytes=32 * 1024 * 1024,      # 3 arrays x 2 bufs x <=2 MiB fits easily
            ),
        )(mids, cs, perm, x2)

        hard_flat = hard_m.reshape(-1)
        idx_flat = idx_m.reshape(-1)

    tail = total - main
    if tail:
        # Rare (< 128 elements): plain jnp instead of padding / concatenating the
        # whole input through HBM before the kernel.
        xt = xf[main:]
        d = (xt[:, None] - centers[None, :]) ** 2
        ti32 = jnp.argmin(d, axis=-1).astype(jnp.int32)
        th = centers[ti32]
        ti = ti32.astype(idx_dtype)
        if hard_flat is None:
            hard_flat, idx_flat = th, ti
        else:
            hard_flat = jnp.concatenate([hard_flat, th])
            idx_flat = jnp.concatenate([idx_flat, ti])

    x_hard = hard_flat.reshape(N, C, H, W)
    x_idx = idx_flat.reshape(N, C, H, W)
    # torch forward: `x_soft.data = x_hard` -> returned x_soft values == x_hard.
    return x_hard, x_hard, x_idx


def _reference_forward(x, centers, sigma):
    """Pure-jnp reference mirroring Quantizer._quantize (forward values)."""
    N, C, H, W = x.shape
    xr = x.reshape(N, C, H * W, 1)
    d = (xr - centers) ** 2
    phi = jax.nn.softmax(-sigma * d, axis=-1)
    x_soft = jnp.sum(centers * phi, axis=-1).reshape(N, C, H, W)
    idx = jnp.argmin(d, axis=-1).reshape(N, C, H, W).astype(jnp.int32)
    x_hard = centers[idx]
    # x_soft.data = x_hard -> forward values of x_soft are x_hard
    return x_hard, x_hard, idx, x_soft


if __name__ == "__main__":
    key = jax.random.PRNGKey(0)
    k_x, k_c = jax.random.split(key)

    # Module config (deterministic, in-script):
    num_centers = 6
    centers_initial_range = (-2, 2)
    sigma = 1.0
    minval, maxval = map(int, centers_initial_range)

    # Mirrors _create_centers_variable default path: uniform in [min, max), sorted.
    centers = jnp.sort(
        jax.random.uniform(k_c, (num_centers,), dtype=jnp.float32) * (maxval - minval) + minval
    )

    # Small NCHW input.
    x = jax.random.normal(k_x, (2, 4, 16, 16), dtype=jnp.float32)

    x_soft, x_hard, x_idx = quantizer_forward(x, centers, sigma)
    jax.block_until_ready((x_soft, x_hard, x_idx))

    # Correctness vs pure-jnp reference (forward values).
    r_soft, r_hard, r_idx, _ = _reference_forward(x, centers, sigma)
    assert jnp.allclose(x_hard, r_hard), "x_hard mismatch"
    assert jnp.allclose(x_soft, r_soft), "x_soft mismatch"
    assert jnp.array_equal(x_idx.astype(jnp.int32), r_idx), "index mismatch"

    # Robustness: unsorted (e.g. trained) centers must be remapped through the sort perm.
    centers_unsorted = centers[::-1]
    u_soft, u_hard, u_idx = quantizer_forward(x, centers_unsorted, sigma)
    ru_hard, _, ru_idx, _ = _reference_forward(x, centers_unsorted, sigma)
    assert jnp.allclose(u_hard, ru_hard), "x_hard mismatch (unsorted centers)"
    assert jnp.array_equal(u_idx.astype(jnp.int32), ru_idx), "index mismatch (unsorted centers)"

    # Robustness: total not a multiple of 128 exercises the jnp tail path.
    x_odd = jax.random.normal(k_x, (1, 2, 5, 7), dtype=jnp.float32)
    o_soft, o_hard, o_idx = quantizer_forward(x_odd, centers, sigma)
    ro_hard, _, ro_idx, _ = _reference_forward(x_odd, centers, sigma)
    assert jnp.allclose(o_hard, ro_hard), "x_hard mismatch (tail path)"
    assert jnp.array_equal(o_idx.astype(jnp.int32), ro_idx), "index mismatch (tail path)"

    print("KERNEL_OK")
</pallas_src>

<mosaic_0001>
module attributes {stable_mosaic.version = 11 : i64} {
  func.func @_quantizer_kernel(%arg0: i32, %arg1: memref<5xf32, #tpu.memory_space<smem>>, %arg2: memref<6xf32, #tpu.memory_space<smem>>, %arg3: memref<6xi32, #tpu.memory_space<smem>>, %arg4: memref<16x128xf32, #tpu.memory_space<vmem>>, %arg5: memref<16x128xf32, #tpu.memory_space<vmem>>, %arg6: memref<16x128xi8, #tpu.memory_space<vmem>>) attributes {dimension_semantics = [#tpu.dimension_semantics<parallel>], iteration_bounds = array<i64: 1>, scalar_prefetch = 3 : i64, scratch_operands = 0 : i64, tpu.core_type = #tpu.core_type<tc>, window_params = [{transform_indices = @transform_0, window_bounds = array<i64: 16, 128>}, {transform_indices = @transform_1, window_bounds = array<i64: 16, 128>}, {transform_indices = @transform_2, window_bounds = array<i64: 16, 128>}]} {
    %c0 = arith.constant 0 : index
    %c0_0 = arith.constant 0 : index
    %0 = vector.load %arg4[%c0, %c0_0] : memref<16x128xf32, #tpu.memory_space<vmem>>, vector<16x128xf32>
    %c0_1 = arith.constant 0 : index
    %1 = memref.load %arg2[%c0_1] : memref<6xf32, #tpu.memory_space<smem>>
    %2 = vector.broadcast %1 : f32 to vector<16x128xf32>
    %c0_2 = arith.constant 0 : index
    %3 = memref.load %arg3[%c0_2] : memref<6xi32, #tpu.memory_space<smem>>
    %4 = vector.broadcast %3 : i32 to vector<16x128xi32>
    %c0_3 = arith.constant 0 : index
    %5 = memref.load %arg1[%c0_3] : memref<5xf32, #tpu.memory_space<smem>>
    %6 = vector.broadcast %5 : f32 to vector<16x128xf32>
    %7 = arith.cmpf ogt, %0, %6 : vector<16x128xf32>
    %c1 = arith.constant 1 : index
    %8 = memref.load %arg2[%c1] : memref<6xf32, #tpu.memory_space<smem>>
    %9 = vector.broadcast %8 : f32 to vector<16x128xf32>
    %10 = arith.select %7, %9, %2 : vector<16x128xi1>, vector<16x128xf32>
    %c1_4 = arith.constant 1 : index
    %11 = memref.load %arg3[%c1_4] : memref<6xi32, #tpu.memory_space<smem>>
    %12 = vector.broadcast %11 : i32 to vector<16x128xi32>
    %13 = arith.select %7, %12, %4 : vector<16x128xi1>, vector<16x128xi32>
    %c1_5 = arith.constant 1 : index
    %14 = memref.load %arg1[%c1_5] : memref<5xf32, #tpu.memory_space<smem>>
    %15 = vector.broadcast %14 : f32 to vector<16x128xf32>
    %16 = arith.cmpf ogt, %0, %15 : vector<16x128xf32>
    %c2 = arith.constant 2 : index
    %17 = memref.load %arg2[%c2] : memref<6xf32, #tpu.memory_space<smem>>
    %18 = vector.broadcast %17 : f32 to vector<16x128xf32>
    %19 = arith.select %16, %18, %10 : vector<16x128xi1>, vector<16x128xf32>
    %c2_6 = arith.constant 2 : index
    %20 = memref.load %arg3[%c2_6] : memref<6xi32, #tpu.memory_space<smem>>
    %21 = vector.broadcast %20 : i32 to vector<16x128xi32>
    %22 = arith.select %16, %21, %13 : vector<16x128xi1>, vector<16x128xi32>
    %c2_7 = arith.constant 2 : index
    %23 = memref.load %arg1[%c2_7] : memref<5xf32, #tpu.memory_space<smem>>
    %24 = vector.broadcast %23 : f32 to vector<16x128xf32>
    %25 = arith.cmpf ogt, %0, %24 : vector<16x128xf32>
    %c3 = arith.constant 3 : index
    %26 = memref.load %arg2[%c3] : memref<6xf32, #tpu.memory_space<smem>>
    %27 = vector.broadcast %26 : f32 to vector<16x128xf32>
    %28 = arith.select %25, %27, %19 : vector<16x128xi1>, vector<16x128xf32>
    %c3_8 = arith.constant 3 : index
    %29 = memref.load %arg3[%c3_8] : memref<6xi32, #tpu.memory_space<smem>>
    %30 = vector.broadcast %29 : i32 to vector<16x128xi32>
    %31 = arith.select %25, %30, %22 : vector<16x128xi1>, vector<16x128xi32>
    %c3_9 = arith.constant 3 : index
    %32 = memref.load %arg1[%c3_9] : memref<5xf32, #tpu.memory_space<smem>>
    %33 = vector.broadcast %32 : f32 to vector<16x128xf32>
    %34 = arith.cmpf ogt, %0, %33 : vector<16x128xf32>
    %c4 = arith.constant 4 : index
    %35 = memref.load %arg2[%c4] : memref<6xf32, #tpu.memory_space<smem>>
    %36 = vector.broadcast %35 : f32 to vector<16x128xf32>
    %37 = arith.select %34, %36, %28 : vector<16x128xi1>, vector<16x128xf32>
    %c4_10 = arith.constant 4 : index
    %38 = memref.load %arg3[%c4_10] : memref<6xi32, #tpu.memory_space<smem>>
    %39 = vector.broadcast %38 : i32 to vector<16x128xi32>
    %40 = arith.select %34, %39, %31 : vector<16x128xi1>, vector<16x128xi32>
    %c4_11 = arith.constant 4 : index
    %41 = memref.load %arg1[%c4_11] : memref<5xf32, #tpu.memory_space<smem>>
    %42 = vector.broadcast %41 : f32 to vector<16x128xf32>
    %43 = arith.cmpf ogt, %0, %42 : vector<16x128xf32>
    %c5 = arith.constant 5 : index
    %44 = memref.load %arg2[%c5] : memref<6xf32, #tpu.memory_space<smem>>
    %45 = vector.broadcast %44 : f32 to vector<16x128xf32>
    %46 = arith.select %43, %45, %37 : vector<16x128xi1>, vector<16x128xf32>
    %c5_12 = arith.constant 5 : index
    %47 = memref.load %arg3[%c5_12] : memref<6xi32, #tpu.memory_space<smem>>
    %48 = vector.broadcast %47 : i32 to vector<16x128xi32>
    %49 = arith.select %43, %48, %40 : vector<16x128xi1>, vector<16x128xi32>
    %c0_13 = arith.constant 0 : index
    %c0_14 = arith.constant 0 : index
    %50 = vector.load %arg5[%c0_13, %c0_14] : memref<16x128xf32, #tpu.memory_space<vmem>>, vector<16x128xf32>
    tpu.vector_store %arg5[%c0_13, %c0_14], %46 {strides = array<i32>} : memref<16x128xf32, #tpu.memory_space<vmem>>, vector<16x128xf32>,
    %51 = arith.trunci %49 : vector<16x128xi32> to vector<16x128xi8>
    %c0_15 = arith.constant 0 : index
    %c0_16 = arith.constant 0 : index
    %52 = vector.load %arg6[%c0_15, %c0_16] : memref<16x128xi8, #tpu.memory_space<vmem>>, vector<16x128xi8>
    tpu.vector_store %arg6[%c0_15, %c0_16], %51 {strides = array<i32>} : memref<16x128xi8, #tpu.memory_space<vmem>>, vector<16x128xi8>,
    return
  }
  func.func @transform_0(%arg0: i32, %arg1: memref<5xf32, #tpu.memory_space<smem>>, %arg2: memref<6xf32, #tpu.memory_space<smem>>, %arg3: memref<6xi32, #tpu.memory_space<smem>>) -> (i32, i32) {
    %c0_i32 = arith.constant 0 : i32
    %c0_i32_0 = arith.constant 0 : i32
    return %arg0, %c0_i32 : i32, i32
  }
  func.func @transform_1(%arg0: i32, %arg1: memref<5xf32, #tpu.memory_space<smem>>, %arg2: memref<6xf32, #tpu.memory_space<smem>>, %arg3: memref<6xi32, #tpu.memory_space<smem>>) -> (i32, i32) {
    %c0_i32 = arith.constant 0 : i32
    %c0_i32_0 = arith.constant 0 : i32
    return %arg0, %c0_i32 : i32, i32
  }
  func.func @transform_2(%arg0: i32, %arg1: memref<5xf32, #tpu.memory_space<smem>>, %arg2: memref<6xf32, #tpu.memory_space<smem>>, %arg3: memref<6xi32, #tpu.memory_space<smem>>) -> (i32, i32) {
    %c0_i32 = arith.constant 0 : i32
    %c0_i32_0 = arith.constant 0 : i32
    return %arg0, %c0_i32 : i32, i32
  }
}

</mosaic_0001>

<bundles_post_ra>
// kernel: tpu_custom_call.1
= control target key start
LH: loop header
LB: loop body
LE: loop exit
PB: predicated region body
PF: predicated region fallthrough
CT: control target
= control target key end

     0   :  { %s272_s18 = smov [#allocation3]   ;;  %s419_s0 = inlined_call_operand.hbm [shape: f32[5], index: 0, kind: input, shape index: {}]   ;;  %s420_s3 = inlined_call_operand.hbm [shape: f32[16,128], index: 3, kind: input, shape index: {}]   ;;  %s421_s4 = inlined_call_operand.hbm [shape: f32[16,128], index: 4, kind: output, shape index: {0}]   ;;  %s422_s5 = inlined_call_operand.hbm [shape: s8[16,128], index: 5, kind: output, shape index: {1}]   ;;  %s423_s1 = inlined_call_operand.vmem [shape: f32[6], index: 1, kind: input, shape index: {}]   ;;  %s424_s2 = inlined_call_operand.vmem [shape: s32[6], index: 2, kind: input, shape index: {}]  }
   0x1   :  { %12 = dma.hbm_to_smem %s419_s0, 16, %s272_s18, [#allocation2] }
   0x2   :  { %s13_s23 = sshll.u32 %s423_s1, 4  ;;  %s17_s26 = sshll.u32 %s424_s2, 4  ;;  %s14_s23 = int_to_ptr.vmem [resolvable:$true] %s13_s23  ;;  %s18_s26 = int_to_ptr.vmem [resolvable:$true] %s17_s26 }
   0x3   :  { %s180_s27 = scalar_lea.vmem %s14_s23, 16  ;;  %p185_p1 = scmp.lt.s32.totalorder %s14_s23, %s14_s23 }
   0x4   :  { %p181_p0 = scmp.ne.s32.totalorder %s14_s23, %s180_s27  ;;  %p186_p2 = scmp.lt.s32.totalorder %s180_s27, %s180_s27 }
   0x6   :  { %p187_p3 = por %p186_p2, %p185_p1 }
   0x8   :  { %p188_p4 = pnand %p187_p3, %p181_p0 }
   0xa   :  { %191 = shalt.err (!%p188_p4)  }
   0xb   :  { %s273_s28 = smov [#allocation4]   ;;  %s192_s0 = scalar_lea.vmem %s18_s26, 16 }
   0xc   :  { %16 = dma.vmem_to_smem %s14_s23, 16, %s273_s28, [#allocation2] }
   0xd   :  { %p193_p5 = scmp.ne.s32.totalorder %s18_s26, %s192_s0  ;;  %p197_p6 = scmp.lt.s32.totalorder %s18_s26, %s18_s26 }
   0xe   :  { %p198_p7 = scmp.lt.s32.totalorder %s192_s0, %s192_s0 }
  0x10   :  { %p199_p8 = por %p198_p7, %p197_p6 }
  0x12   :  { %p200_p9 = pnand %p199_p8, %p193_p5 }
  0x14   :  { %203 = shalt.err (!%p200_p9)  }
  0x15   :  { %s274_s1 = smov [#allocation5]  }
  0x16   :  { %20 = dma.vmem_to_smem %s18_s26, 16, %s274_s1, [#allocation2] }
  0x17   :  { %264 = dma.done.wait [#allocation2], 48 }
  0x18   :  { %265 = vsyncadd [#allocation2], 4294967248 }
  0x19   :  { %22 = sfence }
  0x1a   :  { %23 = vsyncpa [#allocation7], 0 }
  0x1b   :  { %24 = vsyncpa [#allocation8], 0 }
  0x1c   :  { %25 = vsyncpa [#allocation11], 0  ;;  %s275_s2 = smov [#allocation6]  }
  0x1d   :  { %s31_s29 = sshll.u32 %s275_s2, 4  ;;  %s32_s29 = int_to_ptr.vmem [resolvable:$true] %s31_s29 }
  0x1e   :  { %s212_s30 = scalar_lea.vmem %s32_s29, 256  ;;  %p217_p11 = scmp.lt.s32.totalorder %s32_s29, %s32_s29 }
  0x1f   :  { %p213_p10 = scmp.ne.s32.totalorder %s32_s29, %s212_s30  ;;  %p218_p12 = scmp.lt.s32.totalorder %s212_s30, %s212_s30 }
  0x21   :  { %p219_p13 = por %p218_p12, %p217_p11 }
  0x23   :  { %p220_p0 = pnand %p219_p13, %p213_p10 }
  0x25   :  { %223 = shalt.err (!%p220_p0)
}
  0x26   :  { %s276_s6 = smov 128   ;;  %s277_s7 = smov 8  }
  0x27   :  { %37 = dma.hbm_to_vmem [thread:$0]  %s420_s3, 256, %s32_s29, [#allocation7], %s276_s6, %s276_s6, %s277_s7  }
  0x28   :  { %266 = dma.done.wait [#allocation7], 256  }
  0x29   :  { %267 = vsyncadd [#allocation7], 4294967040  ;;  %s43_s10 = sld [smem:[#allocation4]]  ;;  %v41_v0 = vld [vmem:[#allocation6] sm:$0xff]  ;;  %v42_v2 = vld [vmem:[#allocation6 + $0x8] sm:$0xff]  ;;  %s278_s26 = smov [#allocation9]  }
  0x2a   :  { %s47_s11 = sld [smem:[#allocation3]]  ;;  %s120_s27 = sshll.u32 %s278_s26, 4  ;;  %s121_s27 = int_to_ptr.vmem [resolvable:$true] %s120_s27 }
  0x2b   :  { %s148_s12 = sld [smem:[#allocation4 + $0x1]]  ;;  %s279_s28 = smov [#allocation10]  }
  0x2c   :  { %s150_s13 = sld [smem:[#allocation3 + $0x1]]  ;;  %s132_s0 = sshll.u32 %s279_s28, 4  ;;  %s133_s0 = int_to_ptr.vmem [resolvable:$true] %s132_s0 }
  0x2d   :  { %s151_s14 = sld [smem:[#allocation4 + $0x2]]  ;;  %s224_s1 = scalar_lea.vmem %s121_s27, 256 }
  0x2e   :  { %s153_s15 = sld [smem:[#allocation3 + $0x2]]  ;;  %p225_p1 = scmp.ne.s32.totalorder %s121_s27, %s224_s1 }
  0x2f   :  { %v44_v1 = vstv %s43_s10  ;;  %s154_s16 = sld [smem:[#allocation4 + $0x3]]  ;;  %p229_p2 = scmp.lt.s32.totalorder %s121_s27, %s121_s27 }
  0x30   :  { %v48_v3 = vstv %s47_s11  ;;  %s156_s17 = sld [smem:[#allocation3 + $0x3]]  ;;  %p230_p3 = scmp.lt.s32.totalorder %s224_s1, %s224_s1 }
  0x31   :  { %vm327_vm0 = vcmp.gt.f32.partialorder %v41_v0, %v48_v3  ;;  %v52_v5 = vstv %s148_s12  ;;  %s157_s3 = sld [smem:[#allocation4 + $0x4]]  ;;  %vm331_vm1 = vcmp.gt.f32.partialorder %v42_v2, %v48_v3 }
  0x32   :  { %v53_v7 = vsel %vm327_vm0, %v52_v5, %v44_v1  ;;  %v60_v8 = vstv %s150_s13  ;;  %s159_s18 = sld [smem:[#allocation3 + $0x4]]  ;;  %v54_v9 = vsel %vm331_vm1, %v52_v5, %v44_v1  ;;  %p231_p4 = por %p230_p3, %p229_p2 }
  0x33   :  { %vm339_vm2 = vcmp.gt.f32.partialorder %v41_v0, %v60_v8  ;;  %v64_v11 = vstv %s151_s14  ;;  %s160_s19 = sld [smem:[#allocation4 + $0x5]]  ;;  %vm343_vm3 = vcmp.gt.f32.partialorder %v42_v2, %v60_v8 }
  0x34   :  { %v65_v13 = vsel %vm339_vm2, %v64_v11, %v53_v7  ;;  %v72_v14 = vstv %s153_s15  ;;  %v66_v15 = vsel %vm343_vm3, %v64_v11, %v54_v9  ;;  %s351_s20 = sld [smem:[#allocation5]]  ;;  %p232_p5 = pnand %p231_p4, %p225_p1 }
  0x35   :  { %vm353_vm4 = vcmp.gt.f32.partialorder %v41_v0, %v72_v14  ;;  %v76_v17 = vstv %s154_s16  ;;  %vm357_vm5 = vcmp.gt.f32.partialorder %v42_v2, %v72_v14  ;;  %s149_s21 = sld [smem:[#allocation5 + $0x1]] }
  0x36   :  { %v77_v19 = vsel %vm353_vm4, %v76_v17, %v65_v13  ;;  %v84_v20 = vstv %s156_s17  ;;  %v78_v21 = vsel %vm357_vm5, %v76_v17, %v66_v15  ;;  %s152_s22 = sld [smem:[#allocation5 + $0x2]] }
  0x37   :  { %vm365_vm6 = vcmp.gt.f32.partialorder %v41_v0, %v84_v20  ;;  %v88_v23 = vstv %s157_s3  ;;  %vm369_vm7 = vcmp.gt.f32.partialorder %v42_v2, %v84_v20  ;;  %s155_s23 = sld [smem:[#allocation5 + $0x3]] }
  0x38   :  { %v89_v25 = vsel %vm365_vm6, %v88_v23, %v77_v19  ;;  %v96_v26 = vstv %s159_s18  ;;  %v90_v27 = vsel %vm369_vm7, %v88_v23, %v78_v21  ;;  %s158_s24 = sld [smem:[#allocation5 + $0x4]] }
  0x39   :  { %vm377_vm8 = vcmp.gt.f32.partialorder %v41_v0, %v96_v26  ;;  %v100_v29 = vstv %s160_s19  ;;  %vm381_vm9 = vcmp.gt.f32.partialorder %v42_v2, %v96_v26  ;;  %s161_s25 = sld [smem:[#allocation5 + $0x5]] }
  0x3a   :  { %v101_v31 = vsel %vm377_vm8, %v100_v29, %v89_v25  ;;  %v102_v32 = vsel %vm381_vm9, %v100_v29, %v90_v27  ;;  %v46_v33 = vstv %s351_s20 }
  0x3b   :  { %107 = vst [vmem:[#allocation9] sm:$0xff] %v101_v31  ;;  %108 = vst [vmem:[#allocation9 + $0x8] sm:$0xff] %v102_v32  ;;  %v56_v34 = vstv %s149_s21 }
  0x3c   :  { %v57_v35 = vsel %vm327_vm0, %v56_v34, %v46_v33  ;;  %v68_v36 = vstv %s152_s22  ;;  %v58_v37 = vsel %vm331_vm1, %v56_v34, %v46_v33 }
  0x3d   :  { %v69_v38 = vsel %vm339_vm2, %v68_v36, %v57_v35  ;;  %v80_v39 = vstv %s155_s23  ;;  %v70_v40 = vsel %vm343_vm3, %v68_v36, %v58_v37 }
  0x3e   :  { %v81_v41 = vsel %vm353_vm4, %v80_v39, %v69_v38  ;;  %v92_v42 = vstv %s158_s24  ;;  %v82_v43 = vsel %vm357_vm5, %v80_v39, %v70_v40 }
  0x3f   :  { %v93_v44 = vsel %vm365_vm6, %v92_v42, %v81_v41  ;;  %v104_v45 = vstv %s161_s25  ;;  %v94_v46 = vsel %vm369_vm7, %v92_v42, %v82_v43 }
  0x40   :  { %v105_v47 = vsel %vm377_vm8, %v104_v45, %v93_v44  ;;  %v106_v48 = vsel %vm381_vm9, %v104_v45, %v94_v46 }
  0x41   :  { %235 = shalt.err (!%p232_p5)
}
  0x42   :  { %126 = dma.vmem_to_hbm [thread:$0]  %s121_s27, 256, %s421_s4, [#allocation8], %s276_s6, %s276_s6, %s277_s7   ;;  %v109_v49 = vpack.c.b16 %v105_v47, %v105_v47  ;;  %v111_v50 = vpack.c.b16 %v106_v48, %v106_v48 }
  0x43   :  { %s244_s30 = scalar_lea.vmem %s133_s0, 64  ;;  %p249_p7 = scmp.lt.s32.totalorder %s133_s0, %s133_s0 }
  0x44   :  { %v110_v51 = vpack.c.b8 %v109_v49, %v109_v49  ;;  %v112_v52 = vpack.c.b8 %v111_v50, %v111_v50  ;;  %p245_p6 = scmp.ne.s32.totalorder %s133_s0, %s244_s30  ;;  %p250_p8 = scmp.lt.s32.totalorder %s244_s30, %s244_s30 }
  0x46   :  { %113 = vst [vmem:[#allocation10] sm:$0x3] %v110_v51  ;;  %114 = vst [vmem:[#allocation10 + $0x2] sm:$0x3] %v112_v52  ;;  %p251_p9 = por %p250_p8, %p249_p7 }
  0x48   :  { %p252_p10 = pnand %p251_p9, %p245_p6 }
  0x4a   :  { %255 = shalt.err (!%p252_p10)
}
  0x4b   :  { %s280_s8 = smov 32   ;;  %s281_s9 = smov 2  }
  0x4c   :  { %138 = dma.vmem_to_hbm [thread:$0]  %s133_s0, 64, %s422_s5, [#allocation11], %s280_s8, %s280_s8, %s281_s9  }
  0x4d   :  { %268 = dma.done.wait [#allocation8], 256  }
  0x4e   :  { %269 = vsyncadd [#allocation8], 4294967040 }
  0x4f   :  { %270 = dma.done.wait [#allocation11], 64  }
  0x50   :  { %271 = vsyncadd [#allocation11], 4294967232 }
  0x51   :  { %145 = vsyncpa [#allocation7], 1 }
  0x52   :  { %146 = vsyncpa [#allocation8], 1 }
  0x53   :  { %147 = vsyncpa [#allocation11], 1 }

</bundles_post_ra>
